<compile_context>
chip_gen: v5e
topology: v5e:2x2
jax: 0.10.0
libtpu: 0.0.40
codegen_flags: <defaults>
</compile_context>

<pallas_src>
import numpy as np
import jax
import jax.numpy as jnp
from jax.experimental import pallas as pl
from jax.experimental.pallas import tpu as pltpu


_VMEM_LIMIT = 32 * 1024 * 1024  # safe on v5e/v6e (128M) and v7x (64M per TC)


def _round_up(x, m):
    return (x + m - 1) // m * m


# ------------------------------------------------------------------
# Generic fused matmul:  out = epi( relu(a*pscale+pshift) @ b + bias )
# (used for conv0 and the pool-folded transition convs)
# ------------------------------------------------------------------

def _make_mm_kernel(has_pro, has_bias, has_epi, epi_relu):
    def kernel(*refs):
        out_ref = refs[-1]
        idx = 0
        a = refs[idx][...]; idx += 1          # bf16
        b = refs[idx][...]; idx += 1          # bf16
        if has_pro:
            ps = refs[idx][...]; pt = refs[idx + 1][...]; idx += 2
            a = jnp.maximum(a * ps + pt, 0)   # bf16 VPU math (v6e/v7x bf16 VALU)
        acc = jnp.dot(a, b, preferred_element_type=jnp.float32)
        if has_bias:
            acc = acc + refs[idx][...]; idx += 1
        if has_epi:
            es = refs[idx][...]; et = refs[idx + 1][...]; idx += 2
            acc = acc * es + et
            if epi_relu:
                acc = jnp.maximum(acc, 0.0)
        out_ref[...] = acc.astype(out_ref.dtype)
    return kernel


def fused_matmul(a, b, *, pro=None, bias=None, epi=None, epi_relu=True,
                 out_dtype=jnp.bfloat16):
    """a: (M, K) activation, b: (K, N) weight."""
    M, K = a.shape
    Kb_, N = b.shape
    assert K == Kb_, (K, Kb_)

    a = a.astype(jnp.bfloat16)
    b = b.astype(jnp.bfloat16)

    # Largest row tile that comfortably fits VMEM; no forced 2-way M split.
    cap = 512 if K <= 2048 else 256
    bm = min(cap, _round_up(max(M, 8), 8))
    Mp = _round_up(M, bm)
    if Mp != M:
        a = jnp.pad(a, ((0, Mp - M), (0, 0)))

    if N >= 256 and N % 256 == 0:
        bn = 256
    elif N >= 128 and N % 128 == 0:
        bn = 128
    else:
        bn = N

    ops = [a, b]
    specs = [pl.BlockSpec((bm, K), lambda i, j: (i, 0)),
             pl.BlockSpec((K, bn), lambda i, j: (0, j))]
    if pro is not None:
        ps, pt = pro
        ops += [ps.reshape(1, K).astype(jnp.bfloat16),
                pt.reshape(1, K).astype(jnp.bfloat16)]
        specs += [pl.BlockSpec((1, K), lambda i, j: (0, 0))] * 2
    if bias is not None:
        ops.append(bias.reshape(1, N).astype(jnp.float32))
        specs.append(pl.BlockSpec((1, bn), lambda i, j: (0, j)))
    if epi is not None:
        es, et = epi
        ops += [es.reshape(1, N).astype(jnp.float32),
                et.reshape(1, N).astype(jnp.float32)]
        specs += [pl.BlockSpec((1, bn), lambda i, j: (0, j))] * 2

    kernel = _make_mm_kernel(pro is not None, bias is not None,
                             epi is not None, epi_relu)
    out = pl.pallas_call(
        kernel,
        out_shape=jax.ShapeDtypeStruct((Mp, N), out_dtype),
        grid=(Mp // bm, N // bn),
        in_specs=specs,
        out_specs=pl.BlockSpec((bm, bn), lambda i, j: (i, j)),
        compiler_params=pltpu.CompilerParams(
            dimension_semantics=("parallel", "parallel"),
            vmem_limit_bytes=_VMEM_LIMIT),
    )(*ops)
    return out[:M] if Mp != M else out


# ------------------------------------------------------------------
# Fused dense layer:
#   norm1+relu1 (bf16 prologue) -> 1x1 conv -> norm2+relu2 -> per-tap 3x3
#   channel matmul (lane-dense 9*growth output), all in ONE pallas_call.
# ------------------------------------------------------------------

def _dense_layer_kernel(a_ref, w1_ref, w2_ref, s1_ref, t1_ref, s2_ref, t2_ref,
                        o_ref):
    a = jnp.maximum(a_ref[...] * s1_ref[...] + t1_ref[...], 0)          # bf16
    acc1 = jnp.dot(a, w1_ref[...], preferred_element_type=jnp.float32)  # 1x1
    bott = jnp.maximum(acc1 * s2_ref[...] + t2_ref[...], 0.0)           # norm2
    bott = bott.astype(jnp.bfloat16)
    acc2 = jnp.dot(bott, w2_ref[...], preferred_element_type=jnp.float32)
    o_ref[...] = acc2.astype(o_ref.dtype)


def dense_layer(slab, layer, bm):
    """slab: (Mp, C_final) bf16 channel slab; reads only first Kb columns."""
    Mp, _ = slab.shape
    w1, w2 = layer["w1"], layer["w2"]
    kb, cb = w1.shape            # (round_up(C_in,128), 128)
    no = w2.shape[1]             # 9 * growth
    return pl.pallas_call(
        _dense_layer_kernel,
        out_shape=jax.ShapeDtypeStruct((Mp, no), jnp.bfloat16),
        grid=(Mp // bm,),
        in_specs=[
            pl.BlockSpec((bm, kb), lambda i: (i, 0)),
            pl.BlockSpec((kb, cb), lambda i: (0, 0)),
            pl.BlockSpec((cb, no), lambda i: (0, 0)),
            pl.BlockSpec((1, kb), lambda i: (0, 0)),
            pl.BlockSpec((1, kb), lambda i: (0, 0)),
            pl.BlockSpec((1, cb), lambda i: (0, 0)),
            pl.BlockSpec((1, cb), lambda i: (0, 0)),
        ],
        out_specs=pl.BlockSpec((bm, no), lambda i: (i, 0)),
        compiler_params=pltpu.CompilerParams(
            dimension_semantics=("parallel",),
            vmem_limit_bytes=_VMEM_LIMIT),
    )(slab, w1, w2, layer["s1"], layer["t1"], layer["s2"], layer["t2"])


def growth_accumulate(z, n, h, w, growth):
    """9-tap spatially shifted accumulation of the per-tap 1x1 products
    (completes the 3x3 conv). Cheap elementwise adds -> plain XLA, reads Z
    exactly once; no 9x HBM patch duplication."""
    z = z.reshape(n, h, w, 9, growth).astype(jnp.float32)
    zp = jnp.pad(z, ((0, 0), (1, 1), (1, 1), (0, 0), (0, 0)))
    y = None
    for dy in range(3):
        for dx in range(3):
            t = dy * 3 + dx
            s = zp[:, dy:dy + h, dx:dx + w, t, :]
            y = s if y is None else y + s
    return y.astype(jnp.bfloat16)


# ------------------------------------------------------------------
# maxpool 3x3/s2/p1 as 9 elementwise maxes (XLA; input is post-ReLU so zero
# padding == -inf padding). No Pallas kernel needed here.
# ------------------------------------------------------------------

def maxpool_3x3_s2_p1(x):
    nb, h, w, c = x.shape
    ho = (h + 2 - 3) // 2 + 1
    wo = (w + 2 - 3) // 2 + 1
    xp = jnp.pad(x, ((0, 0), (1, 1), (1, 1), (0, 0)))
    out = None
    for i in range(3):
        for j in range(3):
            s = xp[:, i:i + 2 * ho:2, j:j + 2 * wo:2, :]
            out = s if out is None else jnp.maximum(out, s)
    return out


# ------------------------------------------------------------------
# Head: norm5 + ReLU + global average pool + Linear, fused
# ------------------------------------------------------------------

def _head_kernel(x_ref, s_ref, t_ref, w_ref, b_ref, o_ref):
    x = x_ref[...].astype(jnp.float32)
    x = jnp.maximum(x * s_ref[...] + t_ref[...], 0.0)   # norm5 + forward ReLU
    pooled = jnp.mean(x, axis=1)                        # global avg pool
    o_ref[...] = (jnp.dot(pooled, w_ref[...],
                          preferred_element_type=jnp.float32) + b_ref[...])


def head(x, norm5, w, b):
    n, h, ww, c = x.shape
    nc = w.shape[1]
    s5, t5 = norm5
    return pl.pallas_call(
        _head_kernel,
        out_shape=jax.ShapeDtypeStruct((n, nc), jnp.float32),
        compiler_params=pltpu.CompilerParams(vmem_limit_bytes=_VMEM_LIMIT),
    )(x.reshape(n, h * ww, c), s5.reshape(1, c), t5.reshape(1, c),
      w, b.reshape(1, nc))


# ------------------------------------------------------------------
# JAX glue: im2col for conv0 only (patches ordered (kh, kw, C))
# ------------------------------------------------------------------

def _im2col(x, kh, kw, stride, pad):
    n, h, w, c = x.shape
    xp = jnp.pad(x, ((0, 0), (pad, pad), (pad, pad), (0, 0)))
    ho = (h + 2 * pad - kh) // stride + 1
    wo = (w + 2 * pad - kw) // stride + 1
    cols = [xp[:, i:i + stride * ho:stride, j:j + stride * wo:stride, :]
            for i in range(kh) for j in range(kw)]
    patches = jnp.concatenate(cols, axis=-1)
    return patches.reshape(n * ho * wo, kh * kw * c), ho, wo


# ------------------------------------------------------------------
# Parameters (inference-mode BN folded to scale/shift; weights pre-reshaped
# to matmul layouts once here).
# ------------------------------------------------------------------

def init_params(key, num_classes=10, num_channels=6, growth_rate=32,
                bn_size=4, block_config=(6, 12, 24, 16), num_init_features=64):
    keys = iter(jax.random.split(key, 2048))

    def conv_w(cout, cin, kh, kw):
        fan_in = cin * kh * kw
        return (jax.random.normal(next(keys), (cout, cin, kh, kw), jnp.float32)
                / np.sqrt(fan_in))

    def bn(c):
        # non-identity inference stats so the fused scale/shift paths are used
        eps = 1e-5
        gamma = 1.0 + 0.2 * jax.random.uniform(next(keys), (c,), minval=-1., maxval=1.)
        beta = 0.05 * jax.random.normal(next(keys), (c,))
        mean = 0.05 * jax.random.normal(next(keys), (c,))
        var = 1.0 + 0.2 * jax.random.uniform(next(keys), (c,), minval=-1., maxval=1.)
        scale = gamma / jnp.sqrt(var + eps)
        shift = beta - mean * scale
        return scale.astype(jnp.float32), shift.astype(jnp.float32)

    cin_pad = _round_up(num_channels, 8)           # 6 -> 8 for alignment
    w0 = conv_w(num_init_features, num_channels, 7, 7)
    w0 = jnp.pad(w0, ((0, 0), (0, cin_pad - num_channels), (0, 0), (0, 0)))
    conv0_w = (jnp.transpose(w0, (2, 3, 1, 0))
               .reshape(7 * 7 * cin_pad, num_init_features).astype(jnp.bfloat16))

    params = {
        # replaced conv0: nn.Conv2d(num_channels, 64, 7, 2, 3) (bias=True)
        "conv0_w": conv0_w,
        "conv0_b": 0.01 * jax.random.normal(next(keys), (num_init_features,),
                                            jnp.float32),
        "norm0": bn(num_init_features),
        "blocks": [],
        "transitions": [],
    }

    bott_c = bn_size * growth_rate                  # 128
    c = num_init_features
    for bi, n_layers in enumerate(block_config):
        block = []
        for li in range(n_layers):
            cin = c + li * growth_rate
            kb = _round_up(cin, 128)                # slab read width
            s1, t1 = bn(cin)
            s1 = jnp.pad(s1, (0, kb - cin)).reshape(1, kb).astype(jnp.bfloat16)
            t1 = jnp.pad(t1, (0, kb - cin)).reshape(1, kb).astype(jnp.bfloat16)
            w1 = conv_w(bott_c, cin, 1, 1)[:, :, 0, 0].T       # (cin, 128)
            w1 = jnp.pad(w1, ((0, kb - cin), (0, 0))).astype(jnp.bfloat16)
            s2, t2 = bn(bott_c)
            w2 = conv_w(growth_rate, bott_c, 3, 3)              # (g, 128, 3, 3)
            w2 = (jnp.transpose(w2, (1, 2, 3, 0))               # (128, 3, 3, g)
                  .reshape(bott_c, 9 * growth_rate).astype(jnp.bfloat16))
            block.append({"w1": w1, "w2": w2,
                          "s1": s1, "t1": t1,
                          "s2": s2.reshape(1, bott_c),
                          "t2": t2.reshape(1, bott_c)})
        params["blocks"].append(block)
        c = c + n_layers * growth_rate
        if bi != len(block_config) - 1:
            w = conv_w(c // 2, c, 1, 1)[:, :, 0, 0].T           # (c, c//2)
            # fold the 2x2 avg-pool into the 1x1 conv: tile rows x4, /4
            w_pool = (jnp.concatenate([w] * 4, axis=0) / 4.0).astype(jnp.bfloat16)
            scale, shift = bn(c)
            params["transitions"].append({
                "w_pool": w_pool,
                "n_pool": (jnp.tile(scale, 4), jnp.tile(shift, 4)),
            })
            c = c // 2
    params["norm5"] = bn(c)                                      # c == 1024
    params["classifier_w"] = (jax.random.normal(next(keys), (c, num_classes),
                                                jnp.float32) / np.sqrt(c))
    params["classifier_b"] = 0.01 * jax.random.normal(
        next(keys), (num_classes,), jnp.float32)
    return params


# ------------------------------------------------------------------
# Forward
# ------------------------------------------------------------------

def densenet_forward(x_nchw, params):
    x = jnp.transpose(x_nchw, (0, 2, 3, 1)).astype(jnp.bfloat16)   # NHWC bf16
    n = x.shape[0]
    cin_pad = params["conv0_w"].shape[0] // 49
    if x.shape[-1] < cin_pad:
        x = jnp.pad(x, ((0, 0), (0, 0), (0, 0), (0, cin_pad - x.shape[-1])))
    growth = params["blocks"][0][0]["w2"].shape[1] // 9

    # conv0 (+bias) with norm0+relu0 fused as matmul epilogue, then XLA maxpool
    patches, ho, wo = _im2col(x, 7, 7, stride=2, pad=3)
    x = fused_matmul(patches, params["conv0_w"], bias=params["conv0_b"],
                     epi=params["norm0"], epi_relu=True)
    x = x.reshape(n, ho, wo, -1)
    x = maxpool_3x3_s2_p1(x)

    n_blocks = len(params["blocks"])
    for bi, block in enumerate(params["blocks"]):
        _, h, w, c0 = x.shape
        m = n * h * w
        c_final = c0 + len(block) * growth
        bm = min(512, _round_up(m, 8))
        mp = _round_up(m, bm)
        # one channel slab per block (replaces the per-layer concat)
        slab = jnp.zeros((mp, c_final), jnp.bfloat16)
        slab = jax.lax.dynamic_update_slice(slab, x.reshape(m, c0), (0, 0))
        for li, layer in enumerate(block):
            z = dense_layer(slab, layer, bm)                 # (mp, 9*growth)
            y = growth_accumulate(z[:m], n, h, w, growth)    # (n,h,w,growth)
            slab = jax.lax.dynamic_update_slice(
                slab, y.reshape(m, growth), (0, c0 + li * growth))
        x = slab[:m].reshape(n, h, w, c_final)
        if bi != n_blocks - 1:
            t = params["transitions"][bi]
            ho2, wo2 = h // 2, w // 2
            # transition: norm+relu prologue + [1x1 conv + 2x2 avg-pool] folded
            p = x[:, :2 * ho2, :2 * wo2, :].reshape(n, ho2, 2, wo2, 2, c_final)
            p = p.transpose(0, 1, 3, 2, 4, 5).reshape(n * ho2 * wo2, 4 * c_final)
            x = fused_matmul(p, t["w_pool"], pro=t["n_pool"])
            x = x.reshape(n, ho2, wo2, -1)

    # norm5 + forward ReLU + global avg-pool + classifier, fused
    return head(x, params["norm5"], params["classifier_w"],
                params["classifier_b"])


# ------------------------------------------------------------------
# Main
# ------------------------------------------------------------------

if __name__ == "__main__":
    key = jax.random.PRNGKey(0)
    pkey, xkey = jax.random.split(key)

    num_classes = 10
    num_channels = 6
    params = init_params(pkey, num_classes=num_classes,
                         num_channels=num_channels)

    # Numeric spot check: fused dense-layer kernel vs a pure-jnp reference
    # (same bf16 cast points), with the non-identity BN scale/shift exercised.
    layer0 = params["blocks"][0][0]
    kb0 = layer0["w1"].shape[0]
    slab_t = jax.random.normal(jax.random.PRNGKey(1), (128, 256),
                               jnp.float32).astype(jnp.bfloat16)
    got = dense_layer(slab_t, layer0, 128)
    a_r = jnp.maximum(slab_t[:, :kb0] * layer0["s1"] + layer0["t1"], 0)
    acc1 = jnp.dot(a_r, layer0["w1"], preferred_element_type=jnp.float32)
    bott = jnp.maximum(acc1 * layer0["s2"] + layer0["t2"], 0.0).astype(jnp.bfloat16)
    ref = jnp.dot(bott, layer0["w2"],
                  preferred_element_type=jnp.float32).astype(jnp.bfloat16)
    np.testing.assert_allclose(np.asarray(got.astype(jnp.float32)),
                               np.asarray(ref.astype(jnp.float32)),
                               rtol=2e-2, atol=2e-2)

    # small input consistent with the module: NCHW, 6 channels
    x = jax.random.normal(xkey, (2, num_channels, 32, 32), jnp.float32)

    fwd = jax.jit(densenet_forward)
    out = jax.block_until_ready(fwd(x, params))

    assert out.shape == (2, num_classes), out.shape
    assert bool(jnp.all(jnp.isfinite(out)))
    print("KERNEL_OK")
</pallas_src>

<mosaic_0001>
module attributes {stable_mosaic.version = 11 : i64} {
  func.func @_dense_layer_kernel(%arg0: i32, %arg1: memref<128x128xbf16, #tpu.memory_space<vmem>>, %arg2: memref<128x128xbf16, #tpu.memory_space<vmem>>, %arg3: memref<128x288xbf16, #tpu.memory_space<vmem>>, %arg4: memref<1x128xbf16, #tpu.memory_space<vmem>>, %arg5: memref<1x128xbf16, #tpu.memory_space<vmem>>, %arg6: memref<1x128xf32, #tpu.memory_space<vmem>>, %arg7: memref<1x128xf32, #tpu.memory_space<vmem>>, %arg8: memref<128x288xbf16, #tpu.memory_space<vmem>>) attributes {dimension_semantics = [#tpu.dimension_semantics<parallel>], iteration_bounds = array<i64: 1>, scalar_prefetch = 0 : i64, scratch_operands = 0 : i64, tpu.core_type = #tpu.core_type<tc>, window_params = [{transform_indices = @transform_0, window_bounds = array<i64: 128, 128>}, {pipeline_mode = #tpu.pipeline_mode<synchronous>, transform_indices = @transform_1, window_bounds = array<i64: 128, 128>}, {pipeline_mode = #tpu.pipeline_mode<synchronous>, transform_indices = @transform_2, window_bounds = array<i64: 128, 288>}, {pipeline_mode = #tpu.pipeline_mode<synchronous>, transform_indices = @transform_3, window_bounds = array<i64: 1, 128>}, {pipeline_mode = #tpu.pipeline_mode<synchronous>, transform_indices = @transform_4, window_bounds = array<i64: 1, 128>}, {pipeline_mode = #tpu.pipeline_mode<synchronous>, transform_indices = @transform_5, window_bounds = array<i64: 1, 128>}, {pipeline_mode = #tpu.pipeline_mode<synchronous>, transform_indices = @transform_6, window_bounds = array<i64: 1, 128>}, {transform_indices = @transform_7, window_bounds = array<i64: 128, 288>}]} {
    %c0 = arith.constant 0 : index
    %c0_0 = arith.constant 0 : index
    %0 = vector.load %arg1[%c0, %c0_0] : memref<128x128xbf16, #tpu.memory_space<vmem>>, vector<128x128xbf16>
    %c0_1 = arith.constant 0 : index
    %c0_2 = arith.constant 0 : index
    %1 = vector.load %arg4[%c0_1, %c0_2] : memref<1x128xbf16, #tpu.memory_space<vmem>>, vector<1x128xbf16>
    %2 = vector.broadcast %1 : vector<1x128xbf16> to vector<128x128xbf16>
    %3 = arith.mulf %0, %2 : vector<128x128xbf16>
    %c0_3 = arith.constant 0 : index
    %c0_4 = arith.constant 0 : index
    %4 = vector.load %arg5[%c0_3, %c0_4] : memref<1x128xbf16, #tpu.memory_space<vmem>>, vector<1x128xbf16>
    %5 = vector.broadcast %4 : vector<1x128xbf16> to vector<128x128xbf16>
    %6 = arith.addf %3, %5 : vector<128x128xbf16>
    %cst = arith.constant 0.000000e+00 : bf16
    %7 = vector.broadcast %cst : bf16 to vector<128x128xbf16>
    %8 = arith.maximumf %6, %7 : vector<128x128xbf16>
    %c0_5 = arith.constant 0 : index
    %c0_6 = arith.constant 0 : index
    %9 = vector.load %arg2[%c0_5, %c0_6] : memref<128x128xbf16, #tpu.memory_space<vmem>>, vector<128x128xbf16>
    %cst_7 = arith.constant dense<0.000000e+00> : vector<128x128xf32>
    %10 = tpu.matmul %8, %9, %cst_7 {dimension_numbers = #tpu.dot_dimension_numbers<[1], [0], [0], [1], [0, 0, 1, 1], [], []>} : vector<128x128xbf16>, vector<128x128xbf16>, vector<128x128xf32> -> vector<128x128xf32>
    %c0_8 = arith.constant 0 : index
    %c0_9 = arith.constant 0 : index
    %11 = vector.load %arg6[%c0_8, %c0_9] : memref<1x128xf32, #tpu.memory_space<vmem>>, vector<1x128xf32>
    %12 = vector.broadcast %11 : vector<1x128xf32> to vector<128x128xf32>
    %13 = arith.mulf %10, %12 : vector<128x128xf32>
    %c0_10 = arith.constant 0 : index
    %c0_11 = arith.constant 0 : index
    %14 = vector.load %arg7[%c0_10, %c0_11] : memref<1x128xf32, #tpu.memory_space<vmem>>, vector<1x128xf32>
    %15 = vector.broadcast %14 : vector<1x128xf32> to vector<128x128xf32>
    %16 = arith.addf %13, %15 : vector<128x128xf32>
    %cst_12 = arith.constant 0.000000e+00 : f32
    %17 = vector.broadcast %cst_12 : f32 to vector<128x128xf32>
    %18 = arith.maximumf %16, %17 : vector<128x128xf32>
    %19 = arith.truncf %18 : vector<128x128xf32> to vector<128x128xbf16>
    %c0_13 = arith.constant 0 : index
    %c0_14 = arith.constant 0 : index
    %20 = vector.load %arg3[%c0_13, %c0_14] : memref<128x288xbf16, #tpu.memory_space<vmem>>, vector<128x288xbf16>
    %cst_15 = arith.constant dense<0.000000e+00> : vector<128x288xf32>
    %21 = tpu.matmul %19, %20, %cst_15 {dimension_numbers = #tpu.dot_dimension_numbers<[1], [0], [0], [1], [0, 0, 1, 1], [], []>} : vector<128x128xbf16>, vector<128x288xbf16>, vector<128x288xf32> -> vector<128x288xf32>
    %22 = arith.truncf %21 : vector<128x288xf32> to vector<128x288xbf16>
    %c0_16 = arith.constant 0 : index
    %c0_17 = arith.constant 0 : index
    %23 = vector.load %arg8[%c0_16, %c0_17] : memref<128x288xbf16, #tpu.memory_space<vmem>>, vector<128x288xbf16>
    tpu.vector_store %arg8[%c0_16, %c0_17], %22 {strides = array<i32>} : memref<128x288xbf16, #tpu.memory_space<vmem>>, vector<128x288xbf16>,
    return
  }
  func.func @transform_0(%arg0: i32) -> (i32, i32) {
    %c0_i32 = arith.constant 0 : i32
    %c0_i32_0 = arith.constant 0 : i32
    return %arg0, %c0_i32 : i32, i32
  }
  func.func @transform_1(%arg0: i32) -> (i32, i32) {
    %c0_i32 = arith.constant 0 : i32
    %c0_i32_0 = arith.constant 0 : i32
    %c0_i32_1 = arith.constant 0 : i32
    return %c0_i32, %c0_i32_0 : i32, i32
  }
  func.func @transform_2(%arg0: i32) -> (i32, i32) {
    %c0_i32 = arith.constant 0 : i32
    %c0_i32_0 = arith.constant 0 : i32
    %c0_i32_1 = arith.constant 0 : i32
    return %c0_i32, %c0_i32_0 : i32, i32
  }
  func.func @transform_3(%arg0: i32) -> (i32, i32) {
    %c0_i32 = arith.constant 0 : i32
    %c0_i32_0 = arith.constant 0 : i32
    %c0_i32_1 = arith.constant 0 : i32
    return %c0_i32, %c0_i32_0 : i32, i32
  }
  func.func @transform_4(%arg0: i32) -> (i32, i32) {
    %c0_i32 = arith.constant 0 : i32
    %c0_i32_0 = arith.constant 0 : i32
    %c0_i32_1 = arith.constant 0 : i32
    return %c0_i32, %c0_i32_0 : i32, i32
  }
  func.func @transform_5(%arg0: i32) -> (i32, i32) {
    %c0_i32 = arith.constant 0 : i32
    %c0_i32_0 = arith.constant 0 : i32
    %c0_i32_1 = arith.constant 0 : i32
    return %c0_i32, %c0_i32_0 : i32, i32
  }
  func.func @transform_6(%arg0: i32) -> (i32, i32) {
    %c0_i32 = arith.constant 0 : i32
    %c0_i32_0 = arith.constant 0 : i32
    %c0_i32_1 = arith.constant 0 : i32
    return %c0_i32, %c0_i32_0 : i32, i32
  }
  func.func @transform_7(%arg0: i32) -> (i32, i32) {
    %c0_i32 = arith.constant 0 : i32
    %c0_i32_0 = arith.constant 0 : i32
    return %arg0, %c0_i32 : i32, i32
  }
}

</mosaic_0001>

<bundles_post_ra>
// kernel: tpu_custom_call.1
= control target key start
LH: loop header
LB: loop body
LE: loop exit
PB: predicated region body
PF: predicated region fallthrough
CT: control target
= control target key end

     0   :  { %vm810_vm0 = vcmask 257024   ;;  %s1503_s0 = inlined_call_operand.vmem [shape: bf16[128,256], index: 0, kind: input, shape index: {}]   ;;  %s1504_s1 = inlined_call_operand.vmem [shape: bf16[128,128], index: 1, kind: input, shape index: {}]   ;;  %s1505_s2 = inlined_call_operand.vmem [shape: bf16[128,288], index: 2, kind: input, shape index: {}]   ;;  %s1506_s3 = inlined_call_operand.vmem [shape: bf16[1,128], index: 3, kind: input, shape index: {}]   ;;  %s1507_s4 = inlined_call_operand.vmem [shape: bf16[1,128], index: 4, kind: input, shape index: {}]   ;;  %s1508_s5 = inlined_call_operand.vmem [shape: f32[1,128], index: 5, kind: input, shape index: {}]   ;;  %s1509_s6 = inlined_call_operand.vmem [shape: f32[1,128], index: 6, kind: input, shape index: {}]   ;;  %s1510_s7 = inlined_call_operand.vmem [shape: bf16[128,288], index: 7, kind: output, shape index: {}]  }
   0x1   :  { %v985_v0 = vld [vmem:[%s1504_s1 + $0x38] sm:$0xff]  ;;  %v984_v1 = vld [vmem:[%s1504_s1 + $0x30] sm:$0xff]  ;;  %v30_v2 = vld [vmem:[%s1503_s0] sm:$0xf] }
   0x2   :  { %357 = vmatpush.bf16.msra.mxu0 %v985_v0  ;;  %31 = vst [vmem:[#allocation2] sm:$0xf] %v30_v2  ;;  %v32_v3 = vld [vmem:[%s1503_s0 + $0x8] sm:$0xf]  ;;  %v145_v4 = vld [vmem:[%s1506_s3] sm:$0x1] }
   0x3   :  { %33 = vst [vmem:[#allocation2 + $0x4] sm:$0xf] %v32_v3  ;;  %v147_v5 = vpack.i.b16 %v145_v4, %v145_v4  ;;  %v199_v6 = vld [vmem:[%s1507_s4] sm:$0x1]  ;;  %v34_v7 = vld [vmem:[%s1503_s0 + $0x10] sm:$0xf] }
   0x4   :  { %35 = vst [vmem:[#allocation2 + $0x8] sm:$0xf] %v34_v7  ;;  %v36_v8 = vld [vmem:[%s1503_s0 + $0x18] sm:$0xf]  ;;  %v983_v9 = vld [vmem:[%s1504_s1 + $0x28] sm:$0xff]  ;;  %v201_v11 = vpack.i.b16 %v199_v6, %v199_v6  ;;  %v982_v12 = vld [vmem:[%s1504_s1 + $0x20] sm:$0xff] }
   0x5   :  { %v149_v10 = vperm.slane %v147_v5, 0  ;;  %37 = vst [vmem:[#allocation2 + $0xc] sm:$0xf] %v36_v8  ;;  %v38_v14 = vld [vmem:[%s1503_s0 + $0x20] sm:$0xf]  ;;  %v981_v20 = vld [vmem:[%s1504_s1 + $0x18] sm:$0xff] }
   0x6   :  { %358 = vmatpush.bf16.msra.mxu0 %v984_v1  ;;  %v40_v15 = vld [vmem:[%s1503_s0 + $0x28] sm:$0xf]  ;;  %39 = vst [vmem:[#allocation2 + $0x10] sm:$0xf] %v38_v14  ;;  %v203_v19 = vperm.slane %v201_v11, 0  ;;  %v980_v26 = vld [vmem:[%s1504_s1 + $0x10] sm:$0xff] }
   0x7   :  { %v1121_v13 = vunpack.c.l.bf16 %v149_v10  ;;  %41 = vst [vmem:[#allocation2 + $0x14] sm:$0xf] %v40_v15  ;;  %v979_v34 = vld [vmem:[%s1504_s1 + $0x8] sm:$0xff]  ;;  %v978_v39 = vld [vmem:[%s1504_s1] sm:$0xff]  ;;  %v42_v40 = vld [vmem:[%s1503_s0 + $0x30] sm:$0xf] }
   0x8   :  { %v1134_v25 = vunpack.c.l.bf16 %v203_v19  ;;  %v44_v41 = vld [vmem:[%s1503_s0 + $0x38] sm:$0xf]  ;;  %43 = vst [vmem:[#allocation2 + $0x18] sm:$0xf] %v42_v40  ;;  %v46_v56 = vld [vmem:[%s1503_s0 + $0x40] sm:$0xf] }
   0x9   :  { %45 = vst [vmem:[#allocation2 + $0x1c] sm:$0xf] %v44_v41  ;;  %v48_v57 = vld [vmem:[%s1503_s0 + $0x48] sm:$0xf]  ;;  %v50_v8 = vld [vmem:[%s1503_s0 + $0x50] sm:$0xf] }
   0xa   :  { %359 = vmatpush.bf16.msra.mxu0 %v983_v9  ;;  %v1011_v16 = vld [vmem:[#allocation2] sm:$0xff]   ;;  %47 = vst [vmem:[#allocation2 + $0x20] sm:$0xf] %v46_v56  ;;  %v52_v9 = vld [vmem:[%s1503_s0 + $0x58] sm:$0xf] }
   0xb   :  { %v1012_v17 = vunpack.c.l.bf16 %v1011_v16  ;;  %v1013_v18 = vunpack.c.h.bf16 %v1011_v16  ;;  %49 = vst [vmem:[#allocation2 + $0x24] sm:$0xf] %v48_v57  ;;  %v1009_v56 = vld [vmem:[%s1505_s2 + $0xb8] sm:$0xf0] }
   0xc   :  { %v1042_v29 = vld [vmem:[#allocation2 + $0x8] sm:$0xff]   ;;  %51 = vst [vmem:[#allocation2 + $0x28] sm:$0xf] %v50_v8 }
   0xd   :  { %v167_v21 = vmul.f32 %v1012_v17, %v1121_v13  ;;  %v168_v22 = vmul.f32 %v1013_v18, %v1121_v13  ;;  %v1016_v32 = vunpack.c.l.bf16 %v1042_v29  ;;  %v1017_v33 = vunpack.c.h.bf16 %v1042_v29  ;;  %53 = vst [vmem:[#allocation2 + $0x2c] sm:$0xf] %v52_v9  ;;  %v956_v9 = vld [vmem:[%s1505_s2 + $0x90] sm:$0xf] }
   0xe   :  { %360 = vmatpush.bf16.msra.mxu0 %v982_v12  ;;  %v1043_v47 = vld [vmem:[#allocation2 + $0x10] sm:$0xff]  }
   0xf   :  { %v183_v23 = vpack.c.bf16 %v167_v21, %v167_v21  ;;  %v184_v24 = vpack.c.bf16 %v168_v22, %v168_v22  ;;  %v169_v37 = vmul.f32 %v1016_v32, %v1121_v13  ;;  %v170_v38 = vmul.f32 %v1017_v33, %v1121_v13 }
  0x10   :  { %v1020_v50 = vunpack.c.l.bf16 %v1043_v47  ;;  %v1021_v51 = vunpack.c.h.bf16 %v1043_v47  ;;  %v1044_v63 = vld [vmem:[#allocation2 + $0x18] sm:$0xff]  }
  0x11   :  { %v204_v27 = vunpack.c.l.bf16 %v183_v23  ;;  %v205_v28 = vunpack.c.l.bf16 %v184_v24  ;;  %v185_v43 = vpack.c.bf16 %v169_v37, %v169_v37  ;;  %v186_v44 = vpack.c.bf16 %v170_v38, %v170_v38 }
  0x12   :  { %361 = vmatpush.bf16.msra.mxu0 %v981_v20  ;;  %v171_v54 = vmul.f32 %v1020_v50, %v1121_v13  ;;  %v172_v55 = vmul.f32 %v1021_v51, %v1121_v13  ;;  %v1024_v2 = vunpack.c.l.bf16 %v1044_v63  ;;  %v1025_v3 = vunpack.c.h.bf16 %v1044_v63  ;;  %v1045_v16 = vld [vmem:[#allocation2 + $0x20] sm:$0xff]   ;;  %v968_v50 = vld [vmem:[%s1505_s2 + $0xa8] sm:$0xf]  ;;  %v1008_v51 = vld [vmem:[%s1505_s2 + $0xb0] sm:$0xf0] }
  0x13   :  { %v221_v30 = vadd.f32 %v1134_v25, %v204_v27  ;;  %v222_v31 = vadd.f32 %v1134_v25, %v205_v28  ;;  %v206_v45 = vunpack.c.l.bf16 %v185_v43  ;;  %v207_v46 = vunpack.c.l.bf16 %v186_v44  ;;  %v56_v27 = vld [vmem:[%s1503_s0 + $0x68] sm:$0xf]  ;;  %v60_v43 = vld [vmem:[%s1503_s0 + $0x78] sm:$0xf] }
  0x14   :  { %v187_v59 = vpack.c.bf16 %v171_v54, %v171_v54  ;;  %v188_v60 = vpack.c.bf16 %v172_v55, %v172_v55  ;;  %v173_v6 = vmul.f32 %v1024_v2, %v1121_v13  ;;  %v174_v7 = vmul.f32 %v1025_v3, %v1121_v13  ;;  %57 = vst [vmem:[#allocation2 + $0x34] sm:$0xf] %v56_v27  ;;  %v1046_v33 = vld [vmem:[#allocation2 + $0x28] sm:$0xff]   ;;  %v970_v54 = vld [vmem:[%s1505_s2 + $0xb4] sm:$0xf0] }
  0x15   :  { %v269_v35 = vmax.f32 %v221_v30, 0.0  ;;  %v270_v36 = vmax.f32 %v222_v31, 0.0  ;;  %v223_v48 = vadd.f32 %v1134_v25, %v206_v45  ;;  %v224_v49 = vadd.f32 %v1134_v25, %v207_v46  ;;  %61 = vst [vmem:[#allocation2 + $0x3c] sm:$0xf] %v60_v43  ;;  %v976_v55 = vld [vmem:[%s1505_s2 + $0xb0] sm:$0xf] }
  0x16   :  { %362 = vmatpush.bf16.msra.mxu0 %v980_v26  ;;  %v208_v61 = vunpack.c.l.bf16 %v187_v59  ;;  %v209_v62 = vunpack.c.l.bf16 %v188_v60  ;;  %v189_v11 = vpack.c.bf16 %v173_v6, %v173_v6  ;;  %v190_v12 = vpack.c.bf16 %v174_v7, %v174_v7  ;;  %v54_v26 = vld [vmem:[%s1503_s0 + $0x60] sm:$0xf]  ;;  %v946_v27 = vld [vmem:[%s1505_s2 + $0x84] sm:$0xf0] }
  0x17   :  { %v285_v42 = vpack.c.bf16 %v270_v36, %v269_v35  ;;  %v271_v52 = vmax.f32 %v223_v48, 0.0  ;;  %v272_v53 = vmax.f32 %v224_v49, 0.0  ;;  %v1028_v19 = vunpack.c.l.bf16 %v1045_v16  ;;  %55 = vst [vmem:[#allocation2 + $0x30] sm:$0xf] %v54_v26 }
  0x18   :  { %v225_v0 = vadd.f32 %v1134_v25, %v208_v61  ;;  %v226_v1 = vadd.f32 %v1134_v25, %v209_v62  ;;  %v210_v14 = vunpack.c.l.bf16 %v189_v11  ;;  %v211_v15 = vunpack.c.l.bf16 %v190_v12  ;;  %v1004_v11 = vld [vmem:[%s1505_s2 + $0x94] sm:$0xf] }
  0x19   :  { %v286_v58 = vpack.c.bf16 %v272_v53, %v271_v52  ;;  %v1029_v20 = vunpack.c.h.bf16 %v1045_v16  ;;  %v175_v23 = vmul.f32 %v1028_v19, %v1121_v13  ;;  %v1032_v36 = vunpack.c.l.bf16 %v1046_v33  ;;  %v1007_v52 = vld [vmem:[%s1505_s2 + $0xac] sm:$0xf]  ;;  %v1006_v16 = vld [vmem:[%s1505_s2 + $0xa0] sm:$0xf0]  ;;  %v944_v19 = vld [vmem:[%s1505_s2 + $0x78] sm:$0xf] }
  0x1a   :  { %363 = vmatpush.bf16.msra.mxu0 %v979_v34  ;;  %v273_v4 = vmax.f32 %v225_v0, 0.0  ;;  %v274_v5 = vmax.f32 %v226_v1, 0.0  ;;  %v227_v17 = vadd.f32 %v1134_v25, %v210_v14  ;;  %v228_v18 = vadd.f32 %v1134_v25, %v211_v15  ;;  %v958_v14 = vld [vmem:[%s1505_s2 + $0x9c] sm:$0xf0]  ;;  %v964_v15 = vld [vmem:[%s1505_s2 + $0x98] sm:$0xf] }
  0x1b   :  { %v176_v24 = vmul.f32 %v1029_v20, %v1121_v13  ;;  %v191_v29 = vpack.c.bf16 %v175_v23, %v175_v23  ;;  %v1033_v37 = vunpack.c.h.bf16 %v1046_v33  ;;  %v177_v40 = vmul.f32 %v1032_v36, %v1121_v13  ;;  %v1002_v20 = vld [vmem:[%s1505_s2 + $0x80] sm:$0xf0]  ;;  %v932_v33 = vld [vmem:[%s1505_s2 + $0x60] sm:$0xf]  ;;  %v934_v36 = vld [vmem:[%s1505_s2 + $0x6c] sm:$0xf0] }
  0x1c   :  { %v287_v10 = vpack.c.bf16 %v274_v5, %v273_v4  ;;  %v275_v21 = vmax.f32 %v227_v17, 0.0  ;;  %v276_v22 = vmax.f32 %v228_v18, 0.0  ;;  %v969_v53 = vor.u32 %v1008_v51, %v968_v50  ;;  %v995_v51 = vld [vmem:[%s1505_s2 + $0x4c] sm:$0xf] }
  0x1d   :  { %v192_v30 = vpack.c.bf16 %v176_v24, %v176_v24  ;;  %v212_v31 = vunpack.c.l.bf16 %v191_v29  ;;  %v178_v41 = vmul.f32 %v1033_v37, %v1121_v13  ;;  %v193_v45 = vpack.c.bf16 %v177_v40, %v177_v40  ;;  %v1003_v29 = vld [vmem:[%s1505_s2 + $0x88] sm:$0xf0]  ;;  %v940_v37 = vld [vmem:[%s1505_s2 + $0x68] sm:$0xf] }
  0x1e   :  { %364 = vmatpush.bf16.msra.mxu0 %v978_v39  ;;  %v288_v28 = vpack.c.bf16 %v276_v22, %v275_v21  ;;  %v1047_v47 = vld [vmem:[#allocation2 + $0x30] sm:$0xff]   ;;  %v973_v57 = vor.u32 %v1007_v52, %v970_v54  ;;  %630 = vmatpush.bf16.msra.mxu1 %v969_v53  ;;  %v961_v17 = vor.u32 %v1004_v11, %v958_v14  ;;  %v1001_v21 = vld [vmem:[%s1505_s2 + $0x7c] sm:$0xf]  ;;  %v922_v52 = vld [vmem:[%s1505_s2 + $0x54] sm:$0xf0] }
  0x1f   :  { %v213_v32 = vunpack.c.l.bf16 %v192_v30  ;;  %v229_v34 = vadd.f32 %v1134_v25, %v212_v31  ;;  %v194_v46 = vpack.c.bf16 %v178_v41, %v178_v41  ;;  %v214_v48 = vunpack.c.l.bf16 %v193_v45  ;;  %v928_v53 = vld [vmem:[%s1505_s2 + $0x50] sm:$0xf]  ;;  %v991_v11 = vld [vmem:[%s1505_s2 + $0x28] sm:$0xf0] }
  0x20   :  { %v1036_v59 = vunpack.c.l.bf16 %v1047_v47  ;;  %v1037_v62 = vunpack.c.h.bf16 %v1047_v47  ;;  %679 = vmatpush.bf16.msra.mxu2 %v973_v57  ;;  %v965_v18 = vor.u32 %v1006_v16, %v964_v15  ;;  %v945_v26 = vor.u32 %v1002_v20, %v944_v19  ;;  %v986_v19 = vld [vmem:[%s1505_s2 + $0x4] sm:$0xf] }
  0x21   :  { %365 = vmatmul.bf16.vlgmr.msra.gmra.mxu0 %v285_v42  ;;  %v230_v35 = vadd.f32 %v1134_v25, %v213_v32  ;;  %v277_v38 = vmax.f32 %v229_v34, 0.0  ;;  %v58_v42 = vld [vmem:[%s1503_s0 + $0x70] sm:$0xf]  ;;  %v215_v49 = vunpack.c.l.bf16 %v194_v46  ;;  %v231_v60 = vadd.f32 %v1134_v25, %v214_v48  ;;  %v999_v34 = vld [vmem:[%s1505_s2 + $0x68] sm:$0xf0] }
  0x22   :  { %59 = vst [vmem:[#allocation2 + $0x38] sm:$0xf] %v58_v42  ;;  %v179_v63 = vmul.f32 %v1036_v59, %v1121_v13  ;;  %v180_v2 = vmul.f32 %v1037_v62, %v1121_v13  ;;  %v949_v31 = vor.u32 %v1001_v21, %v946_v27  ;;  %v933_v41 = vor.u32 %v999_v34, %v932_v33  ;;  %v908_v59 = vld [vmem:[%s1505_s2 + $0x30] sm:$0xf] }
  0x23   :  { %v278_v39 = vmax.f32 %v230_v35, 0.0  ;;  %v232_v61 = vadd.f32 %v1134_v25, %v215_v49  ;;  %v279_v0 = vmax.f32 %v231_v60, 0.0  ;;  %v998_v35 = vld [vmem:[%s1505_s2 + $0x64] sm:$0xf]  ;;  %v920_v49 = vld [vmem:[%s1505_s2 + $0x48] sm:$0xf]  ;;  %v925_v54 = vor.u32 %v995_v51, %v922_v52 }
  0x24   :  { %v195_v3 = vpack.c.bf16 %v179_v63, %v179_v63  ;;  %v196_v5 = vpack.c.bf16 %v180_v2, %v180_v2  ;;  %680 = vmatpush.bf16.msra.mxu2 %v961_v17  ;;  %v993_v60 = vld [vmem:[%s1505_s2 + $0x38] sm:$0xf0]  ;;  %v910_v63 = vld [vmem:[%s1505_s2 + $0x3c] sm:$0xf0]  ;;  %v886_v21 = vld [vmem:[%s1505_s2 + $0xc] sm:$0xf0] }
  0x25   :  { %v289_v44 = vpack.c.bf16 %v278_v39, %v277_v38  ;;  %v280_v1 = vmax.f32 %v232_v61, 0.0  ;;  %v1000_v38 = vld [vmem:[%s1505_s2 + $0x70] sm:$0xf0]  ;;  %v909_v62 = vor.u32 %v993_v60, %v908_v59  ;;  %v884_v17 = vld [vmem:[%s1505_s2] sm:$0xf] }
  0x26   :  { %v216_v6 = vunpack.c.l.bf16 %v195_v3  ;;  %v217_v8 = vunpack.c.l.bf16 %v196_v5  ;;  %v941_v45 = vor.u32 %v1000_v38, %v940_v37  ;;  %v992_v61 = vld [vmem:[%s1505_s2 + $0x34] sm:$0xf] }
  0x27   :  { %v290_v4 = vpack.c.bf16 %v280_v1, %v279_v0  ;;  %v916_v0 = vld [vmem:[%s1505_s2 + $0x38] sm:$0xf]  ;;  %v994_v1 = vld [vmem:[%s1505_s2 + $0x40] sm:$0xf0]  ;;  %v913_v2 = vor.u32 %v992_v61, %v910_v63 }
  0x28   :  { %v233_v22 = vadd.f32 %v1134_v25, %v216_v6  ;;  %v234_v30 = vadd.f32 %v1134_v25, %v217_v8  ;;  %681 = vmatpush.bf16.msra.mxu2 %v949_v31  ;;  %v917_v3 = vor.u32 %v994_v1, %v916_v0  ;;  %v896_v6 = vld [vmem:[%s1505_s2 + $0x18] sm:$0xf]  ;;  %v989_v8 = vld [vmem:[%s1505_s2 + $0x1c] sm:$0xf]  ;;  %v1358_v31 = vld [vmem:[%s1509_s6] ss:$0 sm:$0xff] }
  0x29   :  { %v1048_v7 = vld [vmem:[#allocation2 + $0x38] sm:$0xff]  }
  0x2a   :  { %v1040_v23 = vunpack.c.l.bf16 %v1048_v7  ;;  %v1041_v24 = vunpack.c.h.bf16 %v1048_v7  ;;  %v281_v42 = vmax.f32 %v233_v22, 0.0  ;;  %v282_v43 = vmax.f32 %v234_v30, 0.0  ;;  %v990_v7 = vld [vmem:[%s1505_s2 + $0x20] sm:$0xf0]  ;;  %v892_v22 = vld [vmem:[%s1505_s2 + $0x8] sm:$0xf] }
  0x2c   :  { %v181_v39 = vmul.f32 %v1040_v23, %v1121_v13  ;;  %v182_v40 = vmul.f32 %v1041_v24, %v1121_v13  ;;  %v291_v48 = vpack.c.bf16 %v282_v43, %v281_v42  ;;  %v996_v13 = vld [vmem:[%s1505_s2 + $0x50] sm:$0xf0]  ;;  %v889_v24 = vor.u32 %v986_v19, %v886_v21 }
  0x2d   :  { %v921_v50 = vor.u32 %v996_v13, %v920_v49  ;;  %v988_v23 = vld [vmem:[%s1505_s2 + $0x10] sm:$0xf0] }
  0x2e   :  { %v197_v46 = vpack.c.bf16 %v181_v39, %v181_v39  ;;  %v198_v47 = vpack.c.bf16 %v182_v40, %v182_v40 }
  0x30   :  { %v219_v57 = vunpack.c.l.bf16 %v198_v47 }
  0x31   :  { %370 = vmatmul.bf16.gmra.mxu0 %v286_v58  ;;  %v977_v58 = vor.u32 %v1009_v56, %v976_v55  ;;  %v997_v55 = vld [vmem:[%s1505_s2 + $0x58] sm:$0xf0]  ;;  %v218_v56 = vunpack.c.l.bf16 %v197_v46 }
  0x32   :  { %v236_v5 = vadd.f32 %v1134_v25, %v219_v57 }
  0x33   :  { %728 = vmatpush.bf16.msra.mxu3 %v977_v58  ;;  %v929_v58 = vor.u32 %v997_v55, %v928_v53 }
  0x34   :  { %v284_v16 = vmax.f32 %v236_v5, 0.0 }
  0x37   :  { %729 = vmatpush.bf16.msra.mxu3 %v965_v18  ;;  %v987_v18 = vld [vmem:[%s1505_s2 + $0x8] sm:$0xf0] }
  0x38   :  { %v885_v20 = vor.u32 %v987_v18, %v884_v17 }
  0x41   :  { %375 = vmatmul.bf16.gmra.mxu0 %v287_v10  ;;  %v1005_v10 = vld [vmem:[%s1505_s2 + $0x98] sm:$0xf0] }
  0x42   :  { %v957_v12 = vor.u32 %v1005_v10, %v956_v9  ;;  %v897_v9 = vor.u32 %v990_v7, %v896_v6  ;;  %v904_v10 = vld [vmem:[%s1505_s2 + $0x20] sm:$0xf] }
  0x43   :  { %v905_v14 = vor.u32 %v991_v11, %v904_v10 }
  0x44   :  { %631 = vmatpush.bf16.msra.mxu1 %v957_v12 }
  0x48   :  { %632 = vmatpush.bf16.msra.mxu1 %v945_v26  ;;  %v893_v26 = vor.u32 %v988_v23, %v892_v22 }
  0x4c   :  { %633 = vmatpush.bf16.msra.mxu1 %v933_v41 }
  0x50   :  { %634 = vmatpush.bf16.msra.mxu1 %v921_v50 }
  0x51   :  { %380 = vmatmul.bf16.gmra.mxu0 %v288_v28  ;;  %v952_v28 = vld [vmem:[%s1505_s2 + $0x80] sm:$0xf] }
  0x52   :  { %v953_v32 = vor.u32 %v1003_v29, %v952_v28  ;;  %v1352_v29 = vld [vmem:[%s1508_s5] ss:$0 sm:$0xff] }
  0x54   :  { %730 = vmatpush.bf16.msra.mxu3 %v953_v32  ;;  %635 = vmatpush.bf16.msra.mxu1 %v909_v62 }
  0x58   :  { %731 = vmatpush.bf16.msra.mxu3 %v941_v45  ;;  %636 = vmatpush.bf16.msra.mxu1 %v897_v9 }
  0x5c   :  { %732 = vmatpush.bf16.msra.mxu3 %v929_v58  ;;  %637 = vmatpush.bf16.msra.mxu1 %v885_v20 }
  0x60   :  { %733 = vmatpush.bf16.msra.mxu3 %v917_v3 }
  0x61   :  { %385 = vmatmul.bf16.gmra.mxu0 %v289_v44  ;;  %v937_v44 = vor.u32 %v998_v35, %v934_v36 }
  0x63   :  { %682 = vmatpush.bf16.msra.mxu2 %v937_v44 }
  0x64   :  { %734 = vmatpush.bf16.msra.mxu3 %v905_v14 }
  0x67   :  { %683 = vmatpush.bf16.msra.mxu2 %v925_v54 }
  0x68   :  { %735 = vmatpush.bf16.msra.mxu3 %v893_v26 }
  0x6b   :  { %684 = vmatpush.bf16.msra.mxu2 %v913_v2 }
  0x71   :  { %390 = vmatmul.bf16.gmra.mxu0 %v290_v4  ;;  %v235_v4 = vadd.f32 %v1134_v25, %v218_v56  ;;  %v898_v25 = vld [vmem:[%s1505_s2 + $0x24] sm:$0xf0] }
  0x72   :  { %v901_v12 = vor.u32 %v989_v8, %v898_v25 }
  0x73   :  { %v283_v15 = vmax.f32 %v235_v4, 0.0 }
  0x74   :  { %685 = vmatpush.bf16.msra.mxu2 %v901_v12 }
  0x75   :  { %v292_v27 = vpack.c.bf16 %v284_v16, %v283_v15 }
  0x78   :  { %686 = vmatpush.bf16.msra.mxu2 %v889_v24 }
  0x81   :  { %395 = vmatmul.bf16.gmra.mxu0 %v291_v48 }
  0x91   :  { %400 = vmatmul.bf16.gmra.mxu0 %v292_v27 }
  0x9e   :  { %v366_v28 = vpop.f32.mrf.mxu0 }
  0x9f   :  { %v410_v30 = vmul.f32 %v1352_v29, %v366_v28 }
  0xa1   :  { %v430_v33 = vadd.f32 %v1358_v31, %v410_v30 }
  0xa3   :  { %v446_v36 = vmax.f32 %v430_v33, 0.0 }
  0xa6   :  { %v368_v32 = vpop.f32.mrf.mxu0 }
  0xa7   :  { %v411_v34 = vmul.f32 %v1352_v29, %v368_v32 }
  0xa9   :  { %v431_v35 = vadd.f32 %v1358_v31, %v411_v34 }
  0xab   :  { %v447_v37 = vmax.f32 %v431_v35, 0.0 }
  0xad   :  { %v462_v38 = vpack.c.bf16 %v447_v37, %v446_v36 }
  0xae   :  { %v371_v39 = vpop.f32.mrf.mxu0 }
  0xaf   :  { %638 = vmatmul.bf16.vlgmr.msra.gmra.mxu1 %v462_v38  ;;  %687 = vmatmul.bf16.vlgmr.msra.gmra.mxu2 %v462_v38  ;;  %v412_v40 = vmul.f32 %v1352_v29, %v371_v39 }
  0xb0   :  { %736 = vmatmul.bf16.vlgmr.msra.gmra.mxu3 %v462_v38 }
  0xb1   :  { %v432_v42 = vadd.f32 %v1358_v31, %v412_v40 }
  0xb3   :  { %v448_v45 = vmax.f32 %v432_v42, 0.0 }
  0xb6   :  { %v373_v41 = vpop.f32.mrf.mxu0 }
  0xb7   :  { %v413_v43 = vmul.f32 %v1352_v29, %v373_v41 }
  0xb9   :  { %v433_v44 = vadd.f32 %v1358_v31, %v413_v43 }
  0xbb   :  { %v449_v46 = vmax.f32 %v433_v44, 0.0 }
  0xbd   :  { %v463_v47 = vpack.c.bf16 %v449_v46, %v448_v45 }
  0xbe   :  { %v376_v48 = vpop.f32.mrf.mxu0 }
  0xbf   :  { %643 = vmatmul.bf16.gmra.mxu1 %v463_v47  ;;  %692 = vmatmul.bf16.gmra.mxu2 %v463_v47  ;;  %v414_v49 = vmul.f32 %v1352_v29, %v376_v48 }
  0xc0   :  { %741 = vmatmul.bf16.gmra.mxu3 %v463_v47 }
  0xc1   :  { %v434_v50 = vadd.f32 %v1358_v31, %v414_v49 }
  0xc3   :  { %v450_v53 = vmax.f32 %v434_v50, 0.0 }
  0xc6   :  { %v378_v13 = vpop.f32.mrf.mxu0 }
  0xc7   :  { %v415_v51 = vmul.f32 %v1352_v29, %v378_v13 }
  0xc9   :  { %v435_v52 = vadd.f32 %v1358_v31, %v415_v51 }
  0xcb   :  { %v451_v54 = vmax.f32 %v435_v52, 0.0 }
  0xcd   :  { %v464_v55 = vpack.c.bf16 %v451_v54, %v450_v53 }
  0xce   :  { %v381_v56 = vpop.f32.mrf.mxu0 }
  0xcf   :  { %648 = vmatmul.bf16.gmra.mxu1 %v464_v55  ;;  %697 = vmatmul.bf16.gmra.mxu2 %v464_v55  ;;  %v416_v57 = vmul.f32 %v1352_v29, %v381_v56 }
  0xd0   :  { %746 = vmatmul.bf16.gmra.mxu3 %v464_v55 }
  0xd1   :  { %v436_v59 = vadd.f32 %v1358_v31, %v416_v57 }
  0xd3   :  { %v452_v62 = vmax.f32 %v436_v59, 0.0 }
  0xd6   :  { %v383_v58 = vpop.f32.mrf.mxu0 }
  0xd7   :  { %v417_v60 = vmul.f32 %v1352_v29, %v383_v58 }
  0xd9   :  { %v437_v61 = vadd.f32 %v1358_v31, %v417_v60 }
  0xdb   :  { %v453_v63 = vmax.f32 %v437_v61, 0.0 }
  0xdd   :  { %v465_v0 = vpack.c.bf16 %v453_v63, %v452_v62 }
  0xde   :  { %v386_v1 = vpop.f32.mrf.mxu0 }
  0xdf   :  { %653 = vmatmul.bf16.gmra.mxu1 %v465_v0  ;;  %702 = vmatmul.bf16.gmra.mxu2 %v465_v0  ;;  %v418_v2 = vmul.f32 %v1352_v29, %v386_v1 }
  0xe0   :  { %751 = vmatmul.bf16.gmra.mxu3 %v465_v0 }
  0xe1   :  { %v438_v4 = vadd.f32 %v1358_v31, %v418_v2 }
  0xe3   :  { %v454_v7 = vmax.f32 %v438_v4, 0.0 }
  0xe6   :  { %v388_v3 = vpop.f32.mrf.mxu0 }
  0xe7   :  { %v419_v5 = vmul.f32 %v1352_v29, %v388_v3 }
  0xe9   :  { %v439_v6 = vadd.f32 %v1358_v31, %v419_v5 }
  0xeb   :  { %v455_v8 = vmax.f32 %v439_v6, 0.0 }
  0xed   :  { %v466_v9 = vpack.c.bf16 %v455_v8, %v454_v7 }
  0xee   :  { %v391_v25 = vpop.f32.mrf.mxu0 }
  0xef   :  { %658 = vmatmul.bf16.gmra.mxu1 %v466_v9  ;;  %707 = vmatmul.bf16.gmra.mxu2 %v466_v9  ;;  %v420_v10 = vmul.f32 %v1352_v29, %v391_v25 }
  0xf0   :  { %756 = vmatmul.bf16.gmra.mxu3 %v466_v9 }
  0xf1   :  { %v440_v12 = vadd.f32 %v1358_v31, %v420_v10 }
  0xf3   :  { %v456_v16 = vmax.f32 %v440_v12, 0.0 }
  0xf6   :  { %v393_v11 = vpop.f32.mrf.mxu0 }
  0xf7   :  { %v421_v14 = vmul.f32 %v1352_v29, %v393_v11 }
  0xf9   :  { %v441_v15 = vadd.f32 %v1358_v31, %v421_v14 }
  0xfb   :  { %v457_v17 = vmax.f32 %v441_v15, 0.0 }
  0xfd   :  { %v467_v18 = vpack.c.bf16 %v457_v17, %v456_v16 }
  0xfe   :  { %v396_v19 = vpop.f32.mrf.mxu0 }
  0xff   :  { %663 = vmatmul.bf16.gmra.mxu1 %v467_v18  ;;  %712 = vmatmul.bf16.gmra.mxu2 %v467_v18  ;;  %v422_v20 = vmul.f32 %v1352_v29, %v396_v19 }
 0x100   :  { %761 = vmatmul.bf16.gmra.mxu3 %v467_v18 }
 0x101   :  { %v442_v22 = vadd.f32 %v1358_v31, %v422_v20 }
 0x103   :  { %v458_v26 = vmax.f32 %v442_v22, 0.0 }
 0x106   :  { %v398_v21 = vpop.f32.mrf.mxu0 }
 0x107   :  { %v423_v23 = vmul.f32 %v1352_v29, %v398_v21 }
 0x109   :  { %v443_v24 = vadd.f32 %v1358_v31, %v423_v23 }
 0x10b   :  { %v459_v27 = vmax.f32 %v443_v24, 0.0 }
 0x10d   :  { %v468_v28 = vpack.c.bf16 %v459_v27, %v458_v26 }
 0x10e   :  { %v401_v30 = vpop.f32.mrf.mxu0 }
 0x10f   :  { %668 = vmatmul.bf16.gmra.mxu1 %v468_v28  ;;  %717 = vmatmul.bf16.gmra.mxu2 %v468_v28  ;;  %v424_v32 = vmul.f32 %v1352_v29, %v401_v30 }
 0x110   :  { %766 = vmatmul.bf16.gmra.mxu3 %v468_v28 }
 0x111   :  { %v444_v34 = vadd.f32 %v1358_v31, %v424_v32 }
 0x113   :  { %v460_v37 = vmax.f32 %v444_v34, 0.0 }
 0x116   :  { %v403_v33 = vpop.f32.mrf.mxu0 }
 0x117   :  { %v425_v35 = vmul.f32 %v1352_v29, %v403_v33 }
 0x119   :  { %v445_v36 = vadd.f32 %v1358_v31, %v425_v35 }
 0x11b   :  { %v461_v38 = vmax.f32 %v445_v36, 0.0 }
 0x11d   :  { %v469_v39 = vpack.c.bf16 %v461_v38, %v460_v37 }
 0x11f   :  { %673 = vmatmul.bf16.gmra.mxu1 %v469_v39  ;;  %722 = vmatmul.bf16.gmra.mxu2 %v469_v39 }
 0x120   :  { %771 = vmatmul.bf16.gmra.mxu3 %v469_v39 }
 0x12c   :  { %v639_v40 = vpop.f32.mrf.mxu1 }
 0x132   :  { %v688_v41 = vpop.f32.mrf.mxu2 }
 0x133   :  { %v777_v42 = vpack.c.bf16 %v688_v41, %v639_v40  ;;  %v737_v43 = vpop.f32.mrf.mxu3 }
 0x134   :  { %v778_v44 = vpack.c.bf16 %v737_v43, %v737_v43  ;;  %v641_v45 = vpop.f32.mrf.mxu1 }
 0x135   :  { %809 = vst [vmem:[%s1510_s7] sm:$0xff] %v777_v42 }
 0x136   :  { %811 = vst.msk [vmem:[%s1510_s7 + $0x8] sm:$0xf] %vm810_vm0, %v778_v44 }
 0x13a   :  { %v690_v29 = vpop.f32.mrf.mxu2 }
 0x13b   :  { %v779_v31 = vpack.c.bf16 %v690_v29, %v641_v45  ;;  %v739_v46 = vpop.f32.mrf.mxu3 }
 0x13c   :  { %v780_v47 = vpack.c.bf16 %v739_v46, %v739_v46  ;;  %v644_v48 = vpop.f32.mrf.mxu1 }
 0x13d   :  { %812 = vst [vmem:[%s1510_s7 + $0xc] sm:$0xff] %v779_v31 }
 0x13e   :  { %813 = vst.msk [vmem:[%s1510_s7 + $0x14] sm:$0xf] %vm810_vm0, %v780_v47 }
 0x142   :  { %v693_v49 = vpop.f32.mrf.mxu2 }
 0x143   :  { %v781_v13 = vpack.c.bf16 %v693_v49, %v644_v48  ;;  %v742_v50 = vpop.f32.mrf.mxu3 }
 0x144   :  { %v782_v51 = vpack.c.bf16 %v742_v50, %v742_v50  ;;  %v646_v52 = vpop.f32.mrf.mxu1 }
 0x145   :  { %814 = vst [vmem:[%s1510_s7 + $0x18] sm:$0xff] %v781_v13 }
 0x146   :  { %815 = vst.msk [vmem:[%s1510_s7 + $0x20] sm:$0xf] %vm810_vm0, %v782_v51 }
 0x14a   :  { %v695_v53 = vpop.f32.mrf.mxu2 }
 0x14b   :  { %v783_v54 = vpack.c.bf16 %v695_v53, %v646_v52  ;;  %v744_v55 = vpop.f32.mrf.mxu3 }
 0x14c   :  { %v784_v56 = vpack.c.bf16 %v744_v55, %v744_v55  ;;  %v649_v57 = vpop.f32.mrf.mxu1 }
 0x14d   :  { %816 = vst [vmem:[%s1510_s7 + $0x24] sm:$0xff] %v783_v54 }
 0x14e   :  { %817 = vst.msk [vmem:[%s1510_s7 + $0x2c] sm:$0xf] %vm810_vm0, %v784_v56 }
 0x152   :  { %v698_v58 = vpop.f32.mrf.mxu2 }
 0x153   :  { %v785_v59 = vpack.c.bf16 %v698_v58, %v649_v57  ;;  %v747_v60 = vpop.f32.mrf.mxu3 }
 0x154   :  { %v786_v61 = vpack.c.bf16 %v747_v60, %v747_v60  ;;  %v651_v62 = vpop.f32.mrf.mxu1 }
 0x155   :  { %818 = vst [vmem:[%s1510_s7 + $0x30] sm:$0xff] %v785_v59 }
 0x156   :  { %819 = vst.msk [vmem:[%s1510_s7 + $0x38] sm:$0xf] %vm810_vm0, %v786_v61 }
 0x15a   :  { %v700_v63 = vpop.f32.mrf.mxu2 }
 0x15b   :  { %v787_v0 = vpack.c.bf16 %v700_v63, %v651_v62  ;;  %v749_v1 = vpop.f32.mrf.mxu3 }
 0x15c   :  { %v788_v2 = vpack.c.bf16 %v749_v1, %v749_v1  ;;  %v654_v3 = vpop.f32.mrf.mxu1 }
 0x15d   :  { %820 = vst [vmem:[%s1510_s7 + $0x3c] sm:$0xff] %v787_v0 }
 0x15e   :  { %821 = vst.msk [vmem:[%s1510_s7 + $0x44] sm:$0xf] %vm810_vm0, %v788_v2 }
 0x162   :  { %v703_v4 = vpop.f32.mrf.mxu2 }
 0x163   :  { %v789_v5 = vpack.c.bf16 %v703_v4, %v654_v3  ;;  %v752_v6 = vpop.f32.mrf.mxu3 }
 0x164   :  { %v790_v7 = vpack.c.bf16 %v752_v6, %v752_v6  ;;  %v656_v8 = vpop.f32.mrf.mxu1 }
 0x165   :  { %822 = vst [vmem:[%s1510_s7 + $0x48] sm:$0xff] %v789_v5 }
 0x166   :  { %823 = vst.msk [vmem:[%s1510_s7 + $0x50] sm:$0xf] %vm810_vm0, %v790_v7 }
 0x16a   :  { %v705_v9 = vpop.f32.mrf.mxu2 }
 0x16b   :  { %v791_v25 = vpack.c.bf16 %v705_v9, %v656_v8  ;;  %v754_v10 = vpop.f32.mrf.mxu3 }
 0x16c   :  { %v792_v11 = vpack.c.bf16 %v754_v10, %v754_v10  ;;  %v659_v12 = vpop.f32.mrf.mxu1 }
 0x16d   :  { %824 = vst [vmem:[%s1510_s7 + $0x54] sm:$0xff] %v791_v25 }
 0x16e   :  { %825 = vst.msk [vmem:[%s1510_s7 + $0x5c] sm:$0xf] %vm810_vm0, %v792_v11 }
 0x172   :  { %v708_v14 = vpop.f32.mrf.mxu2 }
 0x173   :  { %v793_v15 = vpack.c.bf16 %v708_v14, %v659_v12  ;;  %v757_v16 = vpop.f32.mrf.mxu3 }
 0x174   :  { %v794_v17 = vpack.c.bf16 %v757_v16, %v757_v16  ;;  %v661_v18 = vpop.f32.mrf.mxu1 }
 0x175   :  { %826 = vst [vmem:[%s1510_s7 + $0x60] sm:$0xff] %v793_v15 }
 0x176   :  { %827 = vst.msk [vmem:[%s1510_s7 + $0x68] sm:$0xf] %vm810_vm0, %v794_v17 }
 0x17a   :  { %v710_v19 = vpop.f32.mrf.mxu2 }
 0x17b   :  { %v795_v20 = vpack.c.bf16 %v710_v19, %v661_v18  ;;  %v759_v21 = vpop.f32.mrf.mxu3 }
 0x17c   :  { %v796_v22 = vpack.c.bf16 %v759_v21, %v759_v21  ;;  %v664_v23 = vpop.f32.mrf.mxu1 }
 0x17d   :  { %828 = vst [vmem:[%s1510_s7 + $0x6c] sm:$0xff] %v795_v20 }
 0x17e   :  { %829 = vst.msk [vmem:[%s1510_s7 + $0x74] sm:$0xf] %vm810_vm0, %v796_v22 }
 0x182   :  { %v713_v24 = vpop.f32.mrf.mxu2 }
 0x183   :  { %v797_v26 = vpack.c.bf16 %v713_v24, %v664_v23  ;;  %v762_v27 = vpop.f32.mrf.mxu3 }
 0x184   :  { %v798_v28 = vpack.c.bf16 %v762_v27, %v762_v27  ;;  %v666_v30 = vpop.f32.mrf.mxu1 }
 0x185   :  { %830 = vst [vmem:[%s1510_s7 + $0x78] sm:$0xff] %v797_v26 }
 0x186   :  { %831 = vst.msk [vmem:[%s1510_s7 + $0x80] sm:$0xf] %vm810_vm0, %v798_v28 }
 0x18a   :  { %v715_v32 = vpop.f32.mrf.mxu2 }
 0x18b   :  { %v799_v33 = vpack.c.bf16 %v715_v32, %v666_v30  ;;  %v764_v34 = vpop.f32.mrf.mxu3 }
 0x18c   :  { %v800_v35 = vpack.c.bf16 %v764_v34, %v764_v34  ;;  %v669_v36 = vpop.f32.mrf.mxu1 }
 0x18d   :  { %832 = vst [vmem:[%s1510_s7 + $0x84] sm:$0xff] %v799_v33 }
 0x18e   :  { %833 = vst.msk [vmem:[%s1510_s7 + $0x8c] sm:$0xf] %vm810_vm0, %v800_v35 }
 0x192   :  { %v718_v37 = vpop.f32.mrf.mxu2 }
 0x193   :  { %v801_v38 = vpack.c.bf16 %v718_v37, %v669_v36  ;;  %v767_v39 = vpop.f32.mrf.mxu3 }
 0x194   :  { %v802_v40 = vpack.c.bf16 %v767_v39, %v767_v39  ;;  %v671_v41 = vpop.f32.mrf.mxu1 }
 0x195   :  { %834 = vst [vmem:[%s1510_s7 + $0x90] sm:$0xff] %v801_v38 }
 0x196   :  { %835 = vst.msk [vmem:[%s1510_s7 + $0x98] sm:$0xf] %vm810_vm0, %v802_v40 }
 0x19a   :  { %v720_v42 = vpop.f32.mrf.mxu2 }
 0x19b   :  { %v803_v43 = vpack.c.bf16 %v720_v42, %v671_v41  ;;  %v769_v44 = vpop.f32.mrf.mxu3 }
 0x19c   :  { %v804_v45 = vpack.c.bf16 %v769_v44, %v769_v44  ;;  %v674_v29 = vpop.f32.mrf.mxu1 }
 0x19d   :  { %836 = vst [vmem:[%s1510_s7 + $0x9c] sm:$0xff] %v803_v43 }
 0x19e   :  { %837 = vst.msk [vmem:[%s1510_s7 + $0xa4] sm:$0xf] %vm810_vm0, %v804_v45 }
 0x1a2   :  { %v723_v31 = vpop.f32.mrf.mxu2 }
 0x1a3   :  { %v805_v46 = vpack.c.bf16 %v723_v31, %v674_v29  ;;  %v772_v47 = vpop.f32.mrf.mxu3 }
 0x1a4   :  { %v806_v48 = vpack.c.bf16 %v772_v47, %v772_v47  ;;  %v676_v49 = vpop.f32.mrf.mxu1 }
 0x1a5   :  { %838 = vst [vmem:[%s1510_s7 + $0xa8] sm:$0xff] %v805_v46 }
 0x1a6   :  { %839 = vst.msk [vmem:[%s1510_s7 + $0xb0] sm:$0xf] %vm810_vm0, %v806_v48 }
 0x1aa   :  { %v725_v13 = vpop.f32.mrf.mxu2 }
 0x1ab   :  { %v807_v50 = vpack.c.bf16 %v725_v13, %v676_v49  ;;  %v774_v51 = vpop.f32.mrf.mxu3 }
 0x1ac   :  { %v808_v52 = vpack.c.bf16 %v774_v51, %v774_v51 }
 0x1ad   :  { %840 = vst [vmem:[%s1510_s7 + $0xb4] sm:$0xff] %v807_v50 }
 0x1ae   :  { %841 = vst.msk [vmem:[%s1510_s7 + $0xbc] sm:$0xf] %vm810_vm0, %v808_v52 }

</bundles_post_ra>
